<compile_context>
chip_gen: v7x
topology: tpu7x:2x2x1
jax: 0.10.0
libtpu: 0.0.40
codegen_flags: <defaults>
</compile_context>

<pallas_src>
import functools

import jax
import jax.numpy as jnp
from jax.experimental import pallas as pl
from jax.experimental.pallas import tpu as pltpu


def _round_up(n, m):
    return (n + m - 1) // m * m


def _timestep_embed_kernel(B, D_pad, max_len,
                           ts_ref, a_hbm, wp_ref, o_ref, x_sc, sem):
    # ts_ref: SMEM int32[B]             scalar-prefetched timesteps
    # a_hbm : HBM  f32[max_len, D_pad]  precomputed A = pe @ W1^T + b1
    # wp_ref: VMEM [D_pad + 8, D_pad]   packed (w2^T | b2) slab
    # o_ref : VMEM f32[B, D_pad]
    # x_sc  : VMEM f32[B, D_pad]        gathered rows (direct dot operand)
    # sem   : DMA semaphores [B]

    def row_copy(i):
        # Clamp so an out-of-range timestep can never turn into an OOB DMA
        # (PyTorch would raise; here we saturate).
        t = jnp.maximum(jnp.minimum(ts_ref[i], max_len - 1), 0)
        return pltpu.make_async_copy(
            a_hbm.at[pl.ds(t, 1), :], x_sc.at[pl.ds(i, 1), :], sem.at[i])

    # Issue all B row gathers back-to-back, then wait: the HBM latencies
    # overlap instead of serializing.
    for i in range(B):
        row_copy(i).start()
    for i in range(B):
        row_copy(i).wait()

    x = x_sc[...]                                   # [B, D_pad] = pe[ts]@W1^T+b1
    h = x * jax.nn.sigmoid(x)                       # SiLU in f32 (VPU + EUP)

    w2t = wp_ref[0:D_pad, :]                        # [D_pad, D_pad] pre-transposed
    b2 = wp_ref[D_pad:D_pad + 1, :]                 # [1, D_pad]
    o = jnp.dot(h.astype(wp_ref.dtype), w2t,
                preferred_element_type=jnp.float32) + b2
    o_ref[...] = o.astype(o_ref.dtype)


def prepare_timestep_embedder(pe, w1, b1, w2, b2, param_dtype=jnp.float32):
    """One-time setup (NOT in the per-call path).

    * Squeezes pe to [max_len, D] and folds Linear1 into the table:
        A = pe @ W1^T + b1      (bit-identical per row vs doing it per call)
    * Pads the lane (last) dim to a multiple of 128 (lane-dense layout).
    * Packs (w2^T | b2) into one sublane-aligned slab so the kernel has a
      single small parameter input.  param_dtype=jnp.bfloat16 halves its
      DMA/VMEM on v6e/v7x; f32 accumulation is kept inside the kernel.
    """
    max_len, one, D = pe.shape
    assert one == 1, pe.shape
    D_pad = _round_up(max(D, 128), 128)

    hi = jax.lax.Precision.HIGHEST
    pe2d = jnp.asarray(pe, jnp.float32).reshape(max_len, D)
    w1f = jnp.asarray(w1, jnp.float32)
    b1f = jnp.asarray(b1, jnp.float32)
    a = jnp.dot(pe2d, w1f.T, precision=hi) + b1f[None, :]       # [max_len, D]
    a = jnp.pad(a, ((0, 0), (0, D_pad - D)))                    # [max_len, D_pad]

    w2t = jnp.zeros((D_pad, D_pad), jnp.float32)
    w2t = w2t.at[:D, :D].set(jnp.asarray(w2, jnp.float32).T)    # [in, out], padded
    b2p = jnp.zeros((8, D_pad), jnp.float32)
    b2p = b2p.at[0, :D].set(jnp.asarray(b2, jnp.float32))
    slab = jnp.concatenate([w2t, b2p], axis=0).astype(param_dtype)
    return a, slab


def timestep_embedder_forward(timesteps, a_table, slab, latent_dim):
    """timesteps: int[B]; a_table: f32[max_len, D_pad]; slab: [D_pad+8, D_pad].
    Returns [1, B, latent_dim] (== the PyTorch module output)."""
    B = timesteps.shape[0]
    max_len, D_pad = a_table.shape
    rows = slab.shape[0]
    assert rows == D_pad + 8, slab.shape

    kernel = functools.partial(_timestep_embed_kernel, B, D_pad, max_len)

    y = pl.pallas_call(
        kernel,
        out_shape=jax.ShapeDtypeStruct((B, D_pad), jnp.float32),
        grid_spec=pltpu.PrefetchScalarGridSpec(
            num_scalar_prefetch=1,              # timesteps -> SMEM
            grid=(1,),                          # single step: B is tiny
            in_specs=[
                pl.BlockSpec(memory_space=pl.ANY),                  # A stays in HBM
                pl.BlockSpec((rows, D_pad), lambda i, ts: (0, 0)),  # (w2^T|b2) slab
            ],
            out_specs=pl.BlockSpec((B, D_pad), lambda i, ts: (0, 0)),
            scratch_shapes=[
                pltpu.VMEM((B, D_pad), jnp.float32),
                pltpu.SemaphoreType.DMA((B,)),
            ],
        ),
        compiler_params=pltpu.CompilerParams(
            dimension_semantics=("arbitrary",)),
    )(timesteps.astype(jnp.int32), a_table, slab)

    # permute(1, 0, 2) of [B, 1, D] -> [1, B, D]; drop lane padding (glue).
    return y[None, :, :latent_dim]


def make_sinusoidal_pe(max_len, d_model, dtype=jnp.float32):
    """Matches MDM PositionalEncoding.pe (shape [max_len, 1, d_model])."""
    position = jnp.arange(max_len, dtype=dtype)[:, None]                 # [L, 1]
    div_term = jnp.exp(
        jnp.arange(0, d_model, 2, dtype=dtype) * (-jnp.log(10000.0) / d_model)
    )                                                                    # [D/2]
    ang = position * div_term                                            # [L, D/2]
    pe = jnp.zeros((max_len, d_model), dtype=dtype)
    pe = pe.at[:, 0::2].set(jnp.sin(ang))
    pe = pe.at[:, 1::2].set(jnp.cos(ang))
    return pe[:, None, :]                                                # [L, 1, D]


def _reference_forward(timesteps, pe, w1, b1, w2, b2):
    hi = jax.lax.Precision.HIGHEST
    x = pe[timesteps]                                     # [B, 1, D]
    h = jnp.dot(x, w1.T, precision=hi) + b1
    h = h * jax.nn.sigmoid(h)
    o = jnp.dot(h, w2.T, precision=hi) + b2
    return jnp.transpose(o, (1, 0, 2))                    # [1, B, D]


if __name__ == "__main__":
    latent_dim = 32      # D
    batch = 8            # number of timesteps
    max_len = 64

    key = jax.random.PRNGKey(0)
    k_w1, k_b1, k_w2, k_b2, k_t = jax.random.split(key, 5)

    # Deterministic synthetic parameters (nn.Linear shapes: W [out, in], b [out]).
    scale = 1.0 / jnp.sqrt(latent_dim)
    w1 = jax.random.uniform(k_w1, (latent_dim, latent_dim), jnp.float32, -scale, scale)
    b1 = jax.random.uniform(k_b1, (latent_dim,), jnp.float32, -scale, scale)
    w2 = jax.random.uniform(k_w2, (latent_dim, latent_dim), jnp.float32, -scale, scale)
    b2 = jax.random.uniform(k_b2, (latent_dim,), jnp.float32, -scale, scale)

    pe = make_sinusoidal_pe(max_len, latent_dim)           # [max_len, 1, D]
    timesteps = jax.random.randint(k_t, (batch,), 0, max_len, dtype=jnp.int32)

    # One-time setup: fold Linear1 into the table, transpose + pack w2/b2
    # (all hoisted out of the per-call path).
    a_table, slab = prepare_timestep_embedder(pe, w1, b1, w2, b2)
    a_table = jax.block_until_ready(a_table)
    slab = jax.block_until_ready(slab)

    out = timestep_embedder_forward(timesteps, a_table, slab, latent_dim)
    out = jax.block_until_ready(out)

    ref = _reference_forward(timesteps, pe, w1, b1, w2, b2)
    assert out.shape == (1, batch, latent_dim), out.shape
    # Tolerance covers MXU f32 multi-pass vs XLA HIGHEST accumulation order.
    assert jnp.allclose(out, ref, atol=1e-4, rtol=1e-4), "mismatch vs reference"

    print("KERNEL_OK")
</pallas_src>

<mosaic_0001>
module attributes {stable_mosaic.version = 11 : i64} {
  func.func @_timestep_embed_kernel(%arg0: i32, %arg1: memref<8xi32, #tpu.memory_space<smem>>, %arg2: memref<64x128xf32, #tpu.memory_space<any>>, %arg3: memref<136x128xf32, #tpu.memory_space<vmem>>, %arg4: memref<8x128xf32, #tpu.memory_space<vmem>>, %arg5: memref<8x128xf32, #tpu.memory_space<vmem>>, %arg6: memref<8x!tpu.dma_semaphore, #tpu.memory_space<semaphore_mem>>) attributes {dimension_semantics = [#tpu.dimension_semantics<arbitrary>], iteration_bounds = array<i64: 1>, scalar_prefetch = 1 : i64, scratch_operands = 2 : i64, tpu.core_type = #tpu.core_type<tc>, window_params = [{}, {pipeline_mode = #tpu.pipeline_mode<synchronous>, transform_indices = @transform_1, window_bounds = array<i64: 136, 128>}, {pipeline_mode = #tpu.pipeline_mode<synchronous>, transform_indices = @transform_2, window_bounds = array<i64: 8, 128>}]} {
    %c0 = arith.constant 0 : index
    %0 = memref.load %arg1[%c0] : memref<8xi32, #tpu.memory_space<smem>>
    %c63_i32 = arith.constant 63 : i32
    %1 = arith.minsi %0, %c63_i32 : i32
    %c0_i32 = arith.constant 0 : i32
    %2 = arith.maxsi %1, %c0_i32 : i32
    %c0_i32_0 = arith.constant 0 : i32
    %c0_i32_1 = arith.constant 0 : i32
    %3 = tpu.memref_slice %arg2[%2, %c0_i32_1] : memref<64x128xf32, #tpu.memory_space<any>> -> memref<1x128xf32, #tpu.memory_space<any>>
    %c0_i32_2 = arith.constant 0 : i32
    %c0_i32_3 = arith.constant 0 : i32
    %4 = tpu.memref_slice %arg5[%c0_i32_2, %c0_i32_3] : memref<8x128xf32, #tpu.memory_space<vmem>> -> memref<1x128xf32, #tpu.memory_space<vmem>>
    %5 = tpu.memref_slice %arg6[%c0_i32_0] : memref<8x!tpu.dma_semaphore, #tpu.memory_space<semaphore_mem>> -> memref<1x!tpu.dma_semaphore, #tpu.memory_space<semaphore_mem>>
    %6 = tpu.memref_squeeze %5 : memref<1x!tpu.dma_semaphore, #tpu.memory_space<semaphore_mem>> -> memref<!tpu.dma_semaphore, #tpu.memory_space<semaphore_mem>>
    tpu.enqueue_dma source(%3 : memref<1x128xf32, #tpu.memory_space<any>>) target(%4 : memref<1x128xf32, #tpu.memory_space<vmem>>) target_semaphore(%6 : memref<!tpu.dma_semaphore, #tpu.memory_space<semaphore_mem>>)
    %c1 = arith.constant 1 : index
    %7 = memref.load %arg1[%c1] : memref<8xi32, #tpu.memory_space<smem>>
    %c63_i32_4 = arith.constant 63 : i32
    %8 = arith.minsi %7, %c63_i32_4 : i32
    %c0_i32_5 = arith.constant 0 : i32
    %9 = arith.maxsi %8, %c0_i32_5 : i32
    %c1_i32 = arith.constant 1 : i32
    %c0_i32_6 = arith.constant 0 : i32
    %10 = tpu.memref_slice %arg2[%9, %c0_i32_6] : memref<64x128xf32, #tpu.memory_space<any>> -> memref<1x128xf32, #tpu.memory_space<any>>
    %c1_i32_7 = arith.constant 1 : i32
    %c0_i32_8 = arith.constant 0 : i32
    %11 = tpu.memref_slice %arg5[%c1_i32_7, %c0_i32_8] : memref<8x128xf32, #tpu.memory_space<vmem>> -> memref<1x128xf32, #tpu.memory_space<vmem>>
    %12 = tpu.memref_slice %arg6[%c1_i32] : memref<8x!tpu.dma_semaphore, #tpu.memory_space<semaphore_mem>> -> memref<1x!tpu.dma_semaphore, #tpu.memory_space<semaphore_mem>>
    %13 = tpu.memref_squeeze %12 : memref<1x!tpu.dma_semaphore, #tpu.memory_space<semaphore_mem>> -> memref<!tpu.dma_semaphore, #tpu.memory_space<semaphore_mem>>
    tpu.enqueue_dma source(%10 : memref<1x128xf32, #tpu.memory_space<any>>) target(%11 : memref<1x128xf32, #tpu.memory_space<vmem>>) target_semaphore(%13 : memref<!tpu.dma_semaphore, #tpu.memory_space<semaphore_mem>>)
    %c2 = arith.constant 2 : index
    %14 = memref.load %arg1[%c2] : memref<8xi32, #tpu.memory_space<smem>>
    %c63_i32_9 = arith.constant 63 : i32
    %15 = arith.minsi %14, %c63_i32_9 : i32
    %c0_i32_10 = arith.constant 0 : i32
    %16 = arith.maxsi %15, %c0_i32_10 : i32
    %c2_i32 = arith.constant 2 : i32
    %c0_i32_11 = arith.constant 0 : i32
    %17 = tpu.memref_slice %arg2[%16, %c0_i32_11] : memref<64x128xf32, #tpu.memory_space<any>> -> memref<1x128xf32, #tpu.memory_space<any>>
    %c2_i32_12 = arith.constant 2 : i32
    %c0_i32_13 = arith.constant 0 : i32
    %18 = tpu.memref_slice %arg5[%c2_i32_12, %c0_i32_13] : memref<8x128xf32, #tpu.memory_space<vmem>> -> memref<1x128xf32, #tpu.memory_space<vmem>>
    %19 = tpu.memref_slice %arg6[%c2_i32] : memref<8x!tpu.dma_semaphore, #tpu.memory_space<semaphore_mem>> -> memref<1x!tpu.dma_semaphore, #tpu.memory_space<semaphore_mem>>
    %20 = tpu.memref_squeeze %19 : memref<1x!tpu.dma_semaphore, #tpu.memory_space<semaphore_mem>> -> memref<!tpu.dma_semaphore, #tpu.memory_space<semaphore_mem>>
    tpu.enqueue_dma source(%17 : memref<1x128xf32, #tpu.memory_space<any>>) target(%18 : memref<1x128xf32, #tpu.memory_space<vmem>>) target_semaphore(%20 : memref<!tpu.dma_semaphore, #tpu.memory_space<semaphore_mem>>)
    %c3 = arith.constant 3 : index
    %21 = memref.load %arg1[%c3] : memref<8xi32, #tpu.memory_space<smem>>
    %c63_i32_14 = arith.constant 63 : i32
    %22 = arith.minsi %21, %c63_i32_14 : i32
    %c0_i32_15 = arith.constant 0 : i32
    %23 = arith.maxsi %22, %c0_i32_15 : i32
    %c3_i32 = arith.constant 3 : i32
    %c0_i32_16 = arith.constant 0 : i32
    %24 = tpu.memref_slice %arg2[%23, %c0_i32_16] : memref<64x128xf32, #tpu.memory_space<any>> -> memref<1x128xf32, #tpu.memory_space<any>>
    %c3_i32_17 = arith.constant 3 : i32
    %c0_i32_18 = arith.constant 0 : i32
    %25 = tpu.memref_slice %arg5[%c3_i32_17, %c0_i32_18] : memref<8x128xf32, #tpu.memory_space<vmem>> -> memref<1x128xf32, #tpu.memory_space<vmem>>
    %26 = tpu.memref_slice %arg6[%c3_i32] : memref<8x!tpu.dma_semaphore, #tpu.memory_space<semaphore_mem>> -> memref<1x!tpu.dma_semaphore, #tpu.memory_space<semaphore_mem>>
    %27 = tpu.memref_squeeze %26 : memref<1x!tpu.dma_semaphore, #tpu.memory_space<semaphore_mem>> -> memref<!tpu.dma_semaphore, #tpu.memory_space<semaphore_mem>>
    tpu.enqueue_dma source(%24 : memref<1x128xf32, #tpu.memory_space<any>>) target(%25 : memref<1x128xf32, #tpu.memory_space<vmem>>) target_semaphore(%27 : memref<!tpu.dma_semaphore, #tpu.memory_space<semaphore_mem>>)
    %c4 = arith.constant 4 : index
    %28 = memref.load %arg1[%c4] : memref<8xi32, #tpu.memory_space<smem>>
    %c63_i32_19 = arith.constant 63 : i32
    %29 = arith.minsi %28, %c63_i32_19 : i32
    %c0_i32_20 = arith.constant 0 : i32
    %30 = arith.maxsi %29, %c0_i32_20 : i32
    %c4_i32 = arith.constant 4 : i32
    %c0_i32_21 = arith.constant 0 : i32
    %31 = tpu.memref_slice %arg2[%30, %c0_i32_21] : memref<64x128xf32, #tpu.memory_space<any>> -> memref<1x128xf32, #tpu.memory_space<any>>
    %c4_i32_22 = arith.constant 4 : i32
    %c0_i32_23 = arith.constant 0 : i32
    %32 = tpu.memref_slice %arg5[%c4_i32_22, %c0_i32_23] : memref<8x128xf32, #tpu.memory_space<vmem>> -> memref<1x128xf32, #tpu.memory_space<vmem>>
    %33 = tpu.memref_slice %arg6[%c4_i32] : memref<8x!tpu.dma_semaphore, #tpu.memory_space<semaphore_mem>> -> memref<1x!tpu.dma_semaphore, #tpu.memory_space<semaphore_mem>>
    %34 = tpu.memref_squeeze %33 : memref<1x!tpu.dma_semaphore, #tpu.memory_space<semaphore_mem>> -> memref<!tpu.dma_semaphore, #tpu.memory_space<semaphore_mem>>
    tpu.enqueue_dma source(%31 : memref<1x128xf32, #tpu.memory_space<any>>) target(%32 : memref<1x128xf32, #tpu.memory_space<vmem>>) target_semaphore(%34 : memref<!tpu.dma_semaphore, #tpu.memory_space<semaphore_mem>>)
    %c5 = arith.constant 5 : index
    %35 = memref.load %arg1[%c5] : memref<8xi32, #tpu.memory_space<smem>>
    %c63_i32_24 = arith.constant 63 : i32
    %36 = arith.minsi %35, %c63_i32_24 : i32
    %c0_i32_25 = arith.constant 0 : i32
    %37 = arith.maxsi %36, %c0_i32_25 : i32
    %c5_i32 = arith.constant 5 : i32
    %c0_i32_26 = arith.constant 0 : i32
    %38 = tpu.memref_slice %arg2[%37, %c0_i32_26] : memref<64x128xf32, #tpu.memory_space<any>> -> memref<1x128xf32, #tpu.memory_space<any>>
    %c5_i32_27 = arith.constant 5 : i32
    %c0_i32_28 = arith.constant 0 : i32
    %39 = tpu.memref_slice %arg5[%c5_i32_27, %c0_i32_28] : memref<8x128xf32, #tpu.memory_space<vmem>> -> memref<1x128xf32, #tpu.memory_space<vmem>>
    %40 = tpu.memref_slice %arg6[%c5_i32] : memref<8x!tpu.dma_semaphore, #tpu.memory_space<semaphore_mem>> -> memref<1x!tpu.dma_semaphore, #tpu.memory_space<semaphore_mem>>
    %41 = tpu.memref_squeeze %40 : memref<1x!tpu.dma_semaphore, #tpu.memory_space<semaphore_mem>> -> memref<!tpu.dma_semaphore, #tpu.memory_space<semaphore_mem>>
    tpu.enqueue_dma source(%38 : memref<1x128xf32, #tpu.memory_space<any>>) target(%39 : memref<1x128xf32, #tpu.memory_space<vmem>>) target_semaphore(%41 : memref<!tpu.dma_semaphore, #tpu.memory_space<semaphore_mem>>)
    %c6 = arith.constant 6 : index
    %42 = memref.load %arg1[%c6] : memref<8xi32, #tpu.memory_space<smem>>
    %c63_i32_29 = arith.constant 63 : i32
    %43 = arith.minsi %42, %c63_i32_29 : i32
    %c0_i32_30 = arith.constant 0 : i32
    %44 = arith.maxsi %43, %c0_i32_30 : i32
    %c6_i32 = arith.constant 6 : i32
    %c0_i32_31 = arith.constant 0 : i32
    %45 = tpu.memref_slice %arg2[%44, %c0_i32_31] : memref<64x128xf32, #tpu.memory_space<any>> -> memref<1x128xf32, #tpu.memory_space<any>>
    %c6_i32_32 = arith.constant 6 : i32
    %c0_i32_33 = arith.constant 0 : i32
    %46 = tpu.memref_slice %arg5[%c6_i32_32, %c0_i32_33] : memref<8x128xf32, #tpu.memory_space<vmem>> -> memref<1x128xf32, #tpu.memory_space<vmem>>
    %47 = tpu.memref_slice %arg6[%c6_i32] : memref<8x!tpu.dma_semaphore, #tpu.memory_space<semaphore_mem>> -> memref<1x!tpu.dma_semaphore, #tpu.memory_space<semaphore_mem>>
    %48 = tpu.memref_squeeze %47 : memref<1x!tpu.dma_semaphore, #tpu.memory_space<semaphore_mem>> -> memref<!tpu.dma_semaphore, #tpu.memory_space<semaphore_mem>>
    tpu.enqueue_dma source(%45 : memref<1x128xf32, #tpu.memory_space<any>>) target(%46 : memref<1x128xf32, #tpu.memory_space<vmem>>) target_semaphore(%48 : memref<!tpu.dma_semaphore, #tpu.memory_space<semaphore_mem>>)
    %c7 = arith.constant 7 : index
    %49 = memref.load %arg1[%c7] : memref<8xi32, #tpu.memory_space<smem>>
    %c63_i32_34 = arith.constant 63 : i32
    %50 = arith.minsi %49, %c63_i32_34 : i32
    %c0_i32_35 = arith.constant 0 : i32
    %51 = arith.maxsi %50, %c0_i32_35 : i32
    %c7_i32 = arith.constant 7 : i32
    %c0_i32_36 = arith.constant 0 : i32
    %52 = tpu.memref_slice %arg2[%51, %c0_i32_36] : memref<64x128xf32, #tpu.memory_space<any>> -> memref<1x128xf32, #tpu.memory_space<any>>
    %c7_i32_37 = arith.constant 7 : i32
    %c0_i32_38 = arith.constant 0 : i32
    %53 = tpu.memref_slice %arg5[%c7_i32_37, %c0_i32_38] : memref<8x128xf32, #tpu.memory_space<vmem>> -> memref<1x128xf32, #tpu.memory_space<vmem>>
    %54 = tpu.memref_slice %arg6[%c7_i32] : memref<8x!tpu.dma_semaphore, #tpu.memory_space<semaphore_mem>> -> memref<1x!tpu.dma_semaphore, #tpu.memory_space<semaphore_mem>>
    %55 = tpu.memref_squeeze %54 : memref<1x!tpu.dma_semaphore, #tpu.memory_space<semaphore_mem>> -> memref<!tpu.dma_semaphore, #tpu.memory_space<semaphore_mem>>
    tpu.enqueue_dma source(%52 : memref<1x128xf32, #tpu.memory_space<any>>) target(%53 : memref<1x128xf32, #tpu.memory_space<vmem>>) target_semaphore(%55 : memref<!tpu.dma_semaphore, #tpu.memory_space<semaphore_mem>>)
    %c0_39 = arith.constant 0 : index
    %56 = memref.load %arg1[%c0_39] : memref<8xi32, #tpu.memory_space<smem>>
    %c63_i32_40 = arith.constant 63 : i32
    %57 = arith.minsi %56, %c63_i32_40 : i32
    %c0_i32_41 = arith.constant 0 : i32
    %58 = arith.maxsi %57, %c0_i32_41 : i32
    %c0_i32_42 = arith.constant 0 : i32
    %c0_i32_43 = arith.constant 0 : i32
    %59 = tpu.memref_slice %arg2[%58, %c0_i32_43] : memref<64x128xf32, #tpu.memory_space<any>> -> memref<1x128xf32, #tpu.memory_space<any>>
    %c0_i32_44 = arith.constant 0 : i32
    %c0_i32_45 = arith.constant 0 : i32
    %60 = tpu.memref_slice %arg5[%c0_i32_44, %c0_i32_45] : memref<8x128xf32, #tpu.memory_space<vmem>> -> memref<1x128xf32, #tpu.memory_space<vmem>>
    %61 = tpu.memref_slice %arg6[%c0_i32_42] : memref<8x!tpu.dma_semaphore, #tpu.memory_space<semaphore_mem>> -> memref<1x!tpu.dma_semaphore, #tpu.memory_space<semaphore_mem>>
    %62 = tpu.memref_squeeze %61 : memref<1x!tpu.dma_semaphore, #tpu.memory_space<semaphore_mem>> -> memref<!tpu.dma_semaphore, #tpu.memory_space<semaphore_mem>>
    tpu.wait_dma2 semaphore(%62 : memref<!tpu.dma_semaphore, #tpu.memory_space<semaphore_mem>>) src(%59 : memref<1x128xf32, #tpu.memory_space<any>>) dst(%60 : memref<1x128xf32, #tpu.memory_space<vmem>>)
    %c1_46 = arith.constant 1 : index
    %63 = memref.load %arg1[%c1_46] : memref<8xi32, #tpu.memory_space<smem>>
    %c63_i32_47 = arith.constant 63 : i32
    %64 = arith.minsi %63, %c63_i32_47 : i32
    %c0_i32_48 = arith.constant 0 : i32
    %65 = arith.maxsi %64, %c0_i32_48 : i32
    %c1_i32_49 = arith.constant 1 : i32
    %c0_i32_50 = arith.constant 0 : i32
    %66 = tpu.memref_slice %arg2[%65, %c0_i32_50] : memref<64x128xf32, #tpu.memory_space<any>> -> memref<1x128xf32, #tpu.memory_space<any>>
    %c1_i32_51 = arith.constant 1 : i32
    %c0_i32_52 = arith.constant 0 : i32
    %67 = tpu.memref_slice %arg5[%c1_i32_51, %c0_i32_52] : memref<8x128xf32, #tpu.memory_space<vmem>> -> memref<1x128xf32, #tpu.memory_space<vmem>>
    %68 = tpu.memref_slice %arg6[%c1_i32_49] : memref<8x!tpu.dma_semaphore, #tpu.memory_space<semaphore_mem>> -> memref<1x!tpu.dma_semaphore, #tpu.memory_space<semaphore_mem>>
    %69 = tpu.memref_squeeze %68 : memref<1x!tpu.dma_semaphore, #tpu.memory_space<semaphore_mem>> -> memref<!tpu.dma_semaphore, #tpu.memory_space<semaphore_mem>>
    tpu.wait_dma2 semaphore(%69 : memref<!tpu.dma_semaphore, #tpu.memory_space<semaphore_mem>>) src(%66 : memref<1x128xf32, #tpu.memory_space<any>>) dst(%67 : memref<1x128xf32, #tpu.memory_space<vmem>>)
    %c2_53 = arith.constant 2 : index
    %70 = memref.load %arg1[%c2_53] : memref<8xi32, #tpu.memory_space<smem>>
    %c63_i32_54 = arith.constant 63 : i32
    %71 = arith.minsi %70, %c63_i32_54 : i32
    %c0_i32_55 = arith.constant 0 : i32
    %72 = arith.maxsi %71, %c0_i32_55 : i32
    %c2_i32_56 = arith.constant 2 : i32
    %c0_i32_57 = arith.constant 0 : i32
    %73 = tpu.memref_slice %arg2[%72, %c0_i32_57] : memref<64x128xf32, #tpu.memory_space<any>> -> memref<1x128xf32, #tpu.memory_space<any>>
    %c2_i32_58 = arith.constant 2 : i32
    %c0_i32_59 = arith.constant 0 : i32
    %74 = tpu.memref_slice %arg5[%c2_i32_58, %c0_i32_59] : memref<8x128xf32, #tpu.memory_space<vmem>> -> memref<1x128xf32, #tpu.memory_space<vmem>>
    %75 = tpu.memref_slice %arg6[%c2_i32_56] : memref<8x!tpu.dma_semaphore, #tpu.memory_space<semaphore_mem>> -> memref<1x!tpu.dma_semaphore, #tpu.memory_space<semaphore_mem>>
    %76 = tpu.memref_squeeze %75 : memref<1x!tpu.dma_semaphore, #tpu.memory_space<semaphore_mem>> -> memref<!tpu.dma_semaphore, #tpu.memory_space<semaphore_mem>>
    tpu.wait_dma2 semaphore(%76 : memref<!tpu.dma_semaphore, #tpu.memory_space<semaphore_mem>>) src(%73 : memref<1x128xf32, #tpu.memory_space<any>>) dst(%74 : memref<1x128xf32, #tpu.memory_space<vmem>>)
    %c3_60 = arith.constant 3 : index
    %77 = memref.load %arg1[%c3_60] : memref<8xi32, #tpu.memory_space<smem>>
    %c63_i32_61 = arith.constant 63 : i32
    %78 = arith.minsi %77, %c63_i32_61 : i32
    %c0_i32_62 = arith.constant 0 : i32
    %79 = arith.maxsi %78, %c0_i32_62 : i32
    %c3_i32_63 = arith.constant 3 : i32
    %c0_i32_64 = arith.constant 0 : i32
    %80 = tpu.memref_slice %arg2[%79, %c0_i32_64] : memref<64x128xf32, #tpu.memory_space<any>> -> memref<1x128xf32, #tpu.memory_space<any>>
    %c3_i32_65 = arith.constant 3 : i32
    %c0_i32_66 = arith.constant 0 : i32
    %81 = tpu.memref_slice %arg5[%c3_i32_65, %c0_i32_66] : memref<8x128xf32, #tpu.memory_space<vmem>> -> memref<1x128xf32, #tpu.memory_space<vmem>>
    %82 = tpu.memref_slice %arg6[%c3_i32_63] : memref<8x!tpu.dma_semaphore, #tpu.memory_space<semaphore_mem>> -> memref<1x!tpu.dma_semaphore, #tpu.memory_space<semaphore_mem>>
    %83 = tpu.memref_squeeze %82 : memref<1x!tpu.dma_semaphore, #tpu.memory_space<semaphore_mem>> -> memref<!tpu.dma_semaphore, #tpu.memory_space<semaphore_mem>>
    tpu.wait_dma2 semaphore(%83 : memref<!tpu.dma_semaphore, #tpu.memory_space<semaphore_mem>>) src(%80 : memref<1x128xf32, #tpu.memory_space<any>>) dst(%81 : memref<1x128xf32, #tpu.memory_space<vmem>>)
    %c4_67 = arith.constant 4 : index
    %84 = memref.load %arg1[%c4_67] : memref<8xi32, #tpu.memory_space<smem>>
    %c63_i32_68 = arith.constant 63 : i32
    %85 = arith.minsi %84, %c63_i32_68 : i32
    %c0_i32_69 = arith.constant 0 : i32
    %86 = arith.maxsi %85, %c0_i32_69 : i32
    %c4_i32_70 = arith.constant 4 : i32
    %c0_i32_71 = arith.constant 0 : i32
    %87 = tpu.memref_slice %arg2[%86, %c0_i32_71] : memref<64x128xf32, #tpu.memory_space<any>> -> memref<1x128xf32, #tpu.memory_space<any>>
    %c4_i32_72 = arith.constant 4 : i32
    %c0_i32_73 = arith.constant 0 : i32
    %88 = tpu.memref_slice %arg5[%c4_i32_72, %c0_i32_73] : memref<8x128xf32, #tpu.memory_space<vmem>> -> memref<1x128xf32, #tpu.memory_space<vmem>>
    %89 = tpu.memref_slice %arg6[%c4_i32_70] : memref<8x!tpu.dma_semaphore, #tpu.memory_space<semaphore_mem>> -> memref<1x!tpu.dma_semaphore, #tpu.memory_space<semaphore_mem>>
    %90 = tpu.memref_squeeze %89 : memref<1x!tpu.dma_semaphore, #tpu.memory_space<semaphore_mem>> -> memref<!tpu.dma_semaphore, #tpu.memory_space<semaphore_mem>>
    tpu.wait_dma2 semaphore(%90 : memref<!tpu.dma_semaphore, #tpu.memory_space<semaphore_mem>>) src(%87 : memref<1x128xf32, #tpu.memory_space<any>>) dst(%88 : memref<1x128xf32, #tpu.memory_space<vmem>>)
    %c5_74 = arith.constant 5 : index
    %91 = memref.load %arg1[%c5_74] : memref<8xi32, #tpu.memory_space<smem>>
    %c63_i32_75 = arith.constant 63 : i32
    %92 = arith.minsi %91, %c63_i32_75 : i32
    %c0_i32_76 = arith.constant 0 : i32
    %93 = arith.maxsi %92, %c0_i32_76 : i32
    %c5_i32_77 = arith.constant 5 : i32
    %c0_i32_78 = arith.constant 0 : i32
    %94 = tpu.memref_slice %arg2[%93, %c0_i32_78] : memref<64x128xf32, #tpu.memory_space<any>> -> memref<1x128xf32, #tpu.memory_space<any>>
    %c5_i32_79 = arith.constant 5 : i32
    %c0_i32_80 = arith.constant 0 : i32
    %95 = tpu.memref_slice %arg5[%c5_i32_79, %c0_i32_80] : memref<8x128xf32, #tpu.memory_space<vmem>> -> memref<1x128xf32, #tpu.memory_space<vmem>>
    %96 = tpu.memref_slice %arg6[%c5_i32_77] : memref<8x!tpu.dma_semaphore, #tpu.memory_space<semaphore_mem>> -> memref<1x!tpu.dma_semaphore, #tpu.memory_space<semaphore_mem>>
    %97 = tpu.memref_squeeze %96 : memref<1x!tpu.dma_semaphore, #tpu.memory_space<semaphore_mem>> -> memref<!tpu.dma_semaphore, #tpu.memory_space<semaphore_mem>>
    tpu.wait_dma2 semaphore(%97 : memref<!tpu.dma_semaphore, #tpu.memory_space<semaphore_mem>>) src(%94 : memref<1x128xf32, #tpu.memory_space<any>>) dst(%95 : memref<1x128xf32, #tpu.memory_space<vmem>>)
    %c6_81 = arith.constant 6 : index
    %98 = memref.load %arg1[%c6_81] : memref<8xi32, #tpu.memory_space<smem>>
    %c63_i32_82 = arith.constant 63 : i32
    %99 = arith.minsi %98, %c63_i32_82 : i32
    %c0_i32_83 = arith.constant 0 : i32
    %100 = arith.maxsi %99, %c0_i32_83 : i32
    %c6_i32_84 = arith.constant 6 : i32
    %c0_i32_85 = arith.constant 0 : i32
    %101 = tpu.memref_slice %arg2[%100, %c0_i32_85] : memref<64x128xf32, #tpu.memory_space<any>> -> memref<1x128xf32, #tpu.memory_space<any>>
    %c6_i32_86 = arith.constant 6 : i32
    %c0_i32_87 = arith.constant 0 : i32
    %102 = tpu.memref_slice %arg5[%c6_i32_86, %c0_i32_87] : memref<8x128xf32, #tpu.memory_space<vmem>> -> memref<1x128xf32, #tpu.memory_space<vmem>>
    %103 = tpu.memref_slice %arg6[%c6_i32_84] : memref<8x!tpu.dma_semaphore, #tpu.memory_space<semaphore_mem>> -> memref<1x!tpu.dma_semaphore, #tpu.memory_space<semaphore_mem>>
    %104 = tpu.memref_squeeze %103 : memref<1x!tpu.dma_semaphore, #tpu.memory_space<semaphore_mem>> -> memref<!tpu.dma_semaphore, #tpu.memory_space<semaphore_mem>>
    tpu.wait_dma2 semaphore(%104 : memref<!tpu.dma_semaphore, #tpu.memory_space<semaphore_mem>>) src(%101 : memref<1x128xf32, #tpu.memory_space<any>>) dst(%102 : memref<1x128xf32, #tpu.memory_space<vmem>>)
    %c7_88 = arith.constant 7 : index
    %105 = memref.load %arg1[%c7_88] : memref<8xi32, #tpu.memory_space<smem>>
    %c63_i32_89 = arith.constant 63 : i32
    %106 = arith.minsi %105, %c63_i32_89 : i32
    %c0_i32_90 = arith.constant 0 : i32
    %107 = arith.maxsi %106, %c0_i32_90 : i32
    %c7_i32_91 = arith.constant 7 : i32
    %c0_i32_92 = arith.constant 0 : i32
    %108 = tpu.memref_slice %arg2[%107, %c0_i32_92] : memref<64x128xf32, #tpu.memory_space<any>> -> memref<1x128xf32, #tpu.memory_space<any>>
    %c7_i32_93 = arith.constant 7 : i32
    %c0_i32_94 = arith.constant 0 : i32
    %109 = tpu.memref_slice %arg5[%c7_i32_93, %c0_i32_94] : memref<8x128xf32, #tpu.memory_space<vmem>> -> memref<1x128xf32, #tpu.memory_space<vmem>>
    %110 = tpu.memref_slice %arg6[%c7_i32_91] : memref<8x!tpu.dma_semaphore, #tpu.memory_space<semaphore_mem>> -> memref<1x!tpu.dma_semaphore, #tpu.memory_space<semaphore_mem>>
    %111 = tpu.memref_squeeze %110 : memref<1x!tpu.dma_semaphore, #tpu.memory_space<semaphore_mem>> -> memref<!tpu.dma_semaphore, #tpu.memory_space<semaphore_mem>>
    tpu.wait_dma2 semaphore(%111 : memref<!tpu.dma_semaphore, #tpu.memory_space<semaphore_mem>>) src(%108 : memref<1x128xf32, #tpu.memory_space<any>>) dst(%109 : memref<1x128xf32, #tpu.memory_space<vmem>>)
    %c0_95 = arith.constant 0 : index
    %c0_96 = arith.constant 0 : index
    %112 = vector.load %arg5[%c0_95, %c0_96] : memref<8x128xf32, #tpu.memory_space<vmem>>, vector<8x128xf32>
    %113 = arith.negf %112 : vector<8x128xf32>
    %114 = math.exp %113 : vector<8x128xf32>
    %cst = arith.constant 1.000000e+00 : f32
    %115 = vector.broadcast %cst : f32 to vector<8x128xf32>
    %116 = arith.addf %115, %114 : vector<8x128xf32>
    %117 = arith.divf %115, %116 : vector<8x128xf32>
    %118 = arith.mulf %112, %117 : vector<8x128xf32>
    %c0_97 = arith.constant 0 : index
    %c0_98 = arith.constant 0 : index
    %119 = vector.load %arg3[%c0_97, %c0_98] : memref<136x128xf32, #tpu.memory_space<vmem>>, vector<128x128xf32>
    %c128 = arith.constant 128 : index
    %c0_99 = arith.constant 0 : index
    %120 = vector.load %arg3[%c128, %c0_99] : memref<136x128xf32, #tpu.memory_space<vmem>>, vector<1x128xf32>
    %cst_100 = arith.constant dense<0.000000e+00> : vector<8x128xf32>
    %121 = tpu.matmul %118, %119, %cst_100 {dimension_numbers = #tpu.dot_dimension_numbers<[1], [0], [0], [1], [0, 0, 1, 1], [], []>} : vector<8x128xf32>, vector<128x128xf32>, vector<8x128xf32> -> vector<8x128xf32>
    %122 = vector.broadcast %120 : vector<1x128xf32> to vector<8x128xf32>
    %123 = arith.addf %121, %122 : vector<8x128xf32>
    %c0_101 = arith.constant 0 : index
    %c0_102 = arith.constant 0 : index
    %124 = vector.load %arg4[%c0_101, %c0_102] : memref<8x128xf32, #tpu.memory_space<vmem>>, vector<8x128xf32>
    tpu.vector_store %arg4[%c0_101, %c0_102], %123 {strides = array<i32>} : memref<8x128xf32, #tpu.memory_space<vmem>>, vector<8x128xf32>,
    return
  }
  func.func @transform_1(%arg0: i32, %arg1: memref<8xi32, #tpu.memory_space<smem>>) -> (i32, i32) {
    %c0_i32 = arith.constant 0 : i32
    %c0_i32_0 = arith.constant 0 : i32
    %c0_i32_1 = arith.constant 0 : i32
    return %c0_i32, %c0_i32_0 : i32, i32
  }
  func.func @transform_2(%arg0: i32, %arg1: memref<8xi32, #tpu.memory_space<smem>>) -> (i32, i32) {
    %c0_i32 = arith.constant 0 : i32
    %c0_i32_0 = arith.constant 0 : i32
    %c0_i32_1 = arith.constant 0 : i32
    return %c0_i32, %c0_i32_0 : i32, i32
  }
}

</mosaic_0001>

<bundles_post_ra>
// kernel: tpu_custom_call.1
= control target key start
LH: loop header
LB: loop body
LE: loop exit
PB: predicated region body
PF: predicated region fallthrough
CT: control target
= control target key end

     0   :  { %s1086_s0 = inlined_call_operand.hbm [shape: s32[8], index: 0, kind: input, shape index: {}]   ;;  %s1087_s1 = inlined_call_operand.hbm [shape: f32[64,128], index: 1, kind: input, shape index: {}]   ;;  %s1088_s2 = inlined_call_operand.hbm [shape: f32[136,128], index: 2, kind: input, shape index: {}]   ;;  %s1089_s3 = inlined_call_operand.hbm [shape: f32[8,128], index: 3, kind: output, shape index: {}]  }
   0x1   :  { %s575_s14 = scalar_lea.hbm %s1086_s0, 16 }
   0x2   :  { %p576_p0 = scmp.ne.s32.totalorder %s1086_s0, %s575_s14  ;;  %p579_p1 = scmp.lt.u32.totalorder %s575_s14, %s1086_s0 }
   0x4   :  { %p581_p2 = pnand %p579_p1, %p576_p0 }
   0x6   :  { %584 = shalt.err (!%p581_p2)  }
   0x7   :  { %s843_s19 = smov [#allocation5]  }
   0x8   :  { %9 = dma.hbm_to_smem %s1086_s0, 16, %s843_s19, [#allocation4] }
   0x9   :  { %821 = dma.done.wait [#allocation4], 16 }
   0xa   :  { %822 = vsyncadd [#allocation4], 4294967280 }
   0xb   :  { %11 = sfence }
   0xc   :  { %12 = vsyncpa [#allocation7], 0 }
   0xd   :  { %13 = vsyncpa [#allocation8], 0  ;;  %s844_s22 = smov [#allocation6]   ;;  %s585_s26 = scalar_lea.hbm %s1088_s2, 2176 }
   0xe   :  { %s19_s23 = sshll.u32 %s844_s22, 4  ;;  %p586_p3 = scmp.ne.s32.totalorder %s1088_s2, %s585_s26  ;;  %s20_s23 = int_to_ptr.vmem [resolvable:$true] %s19_s23 }
   0xf   :  { %p589_p4 = scmp.lt.u32.totalorder %s585_s26, %s1088_s2 }
  0x11   :  { %p591_p5 = pnand %p589_p4, %p586_p3 }
  0x13   :  { %594 = shalt.err (!%p591_p5)
}
  0x14   :  { %s595_s0 = scalar_lea.vmem %s20_s23, 2176  ;;  %p600_p7 = scmp.lt.s32.totalorder %s20_s23, %s20_s23 }
  0x15   :  { %p596_p6 = scmp.ne.s32.totalorder %s20_s23, %s595_s0  ;;  %p601_p8 = scmp.lt.s32.totalorder %s595_s0, %s595_s0 }
  0x17   :  { %p602_p9 = por %p601_p8, %p600_p7 }
  0x19   :  { %p603_p10 = pnand %p602_p9, %p596_p6 }
  0x1b   :  { %606 = shalt.err (!%p603_p10)
}
  0x1c   :  { %s845_s4 = smov 128   ;;  %s846_s5 = smov 8  }
  0x1d   :  { %25 = dma.hbm_to_vmem [thread:$0]  %s1088_s2, 2176, %s20_s23, [#allocation7], %s845_s4, %s845_s4, %s846_s5  }
  0x1e   :  { %823 = dma.done.wait [#allocation7], 2176  }
  0x1f   :  { %824 = vsyncadd [#allocation7], 4294965120  ;;  %s29_s8 = sld [smem:[#allocation5]]  ;;  %s847_s9 = smov [#allocation2]  }
  0x20   :  { %s43_s10 = sshll.u32 %s847_s9, 4  ;;  %s404_s11 = sld [smem:[#allocation5 + $0x1]]  ;;  %s903_s10 = int_to_ptr.vmem [resolvable:$true] %s43_s10 }
  0x21   :  { %s848_s12 = smov [#allocation2 + $0x1]   ;;  %s905_s14 = sld [smem:[#allocation5 + $0x2]] }
  0x22   :  { %s63_s13 = sshll.u32 %s848_s12, 4  ;;  %s849_s15 = smov [#allocation2 + $0x2]   ;;  %s907_s13 = int_to_ptr.vmem [resolvable:$true] %s63_s13 }
  0x23   :  { %s83_s16 = sshll.u32 %s849_s15, 4  ;;  %s909_s17 = sld [smem:[#allocation5 + $0x3]]  ;;  %s911_s16 = int_to_ptr.vmem [resolvable:$true] %s83_s16 }
  0x24   :  { %s920_s25 = scalar_lea.hbm %s1087_s1, 1024 }
  0x25   :  { %p30_p11 = scmp.lt.s32.totalorder %s29_s8, 63  ;;  %p398_p12 = scmp.gt.s32.totalorder %s29_s8, 0 }
  0x26   :  { %p48_p13 = scmp.lt.s32.totalorder %s404_s11, 63  ;;  %p405_p0 = scmp.gt.s32.totalorder %s404_s11, 0 }
  0x27   :  { %s1093_s8 = smov (!%p30_p11, %s29_s8), 63  ;;  %p68_p1 = scmp.lt.s32.totalorder %s905_s14, 63 }
  0x28   :  { %s1095_s11 = smov (!%p48_p13, %s404_s11), 63  ;;  %s1097_s8 = smov (!%p398_p12, %s1093_s8), 0 }
  0x29   :  { %s1099_s11 = smov (!%p405_p0, %s1095_s11), 0  ;;  %s403_s2 = sshll.u32 %s1097_s8, 4 }
  0x2a   :  { %s35_s20 = scalar_lea.hbm %s1087_s1, %s403_s2  ;;  %s410_s21 = sshll.u32 %s1099_s11, 4 }
  0x2b   :  { %s607_s22 = scalar_lea.hbm %s35_s20, 16  ;;  %p610_p3 = scmp.lt.u32.totalorder %s35_s20, %s1087_s1 }
  0x2c   :  { %p608_p2 = scmp.ne.s32.totalorder %s35_s20, %s607_s22  ;;  %p611_p4 = scmp.lt.u32.totalorder %s920_s25, %s607_s22 }
  0x2d   :  { %p613_p6 = scmp.lt.u32.totalorder %s607_s22, %s35_s20 }
  0x2e   :  { %p612_p5 = por %p611_p4, %p610_p3 }
  0x30   :  { %p614_p7 = por %p613_p6, %p612_p5 }
  0x32   :  { %p615_p8 = pnand %p614_p7, %p608_p2 }
  0x34   :  { %618 = shalt.err (!%p615_p8)  }
  0x35   :  { %s619_s28 = scalar_lea.vmem %s903_s10, 16  ;;  %s929_s29 = scalar_lea.vmem %s903_s10, 128 }
  0x36   :  { %p620_p9 = scmp.ne.s32.totalorder %s903_s10, %s619_s28  ;;  %p624_p10 = scmp.lt.s32.totalorder %s903_s10, %s903_s10 }
  0x37   :  { %p625_p11 = scmp.lt.s32.totalorder %s929_s29, %s619_s28 }
  0x39   :  { %p626_p12 = por %p625_p11, %p624_p10 }
  0x3b   :  { %p627_p13 = pnand %p626_p12, %p620_p9 }
  0x3d   :  { %630 = shalt.err (!%p627_p13)  }
  0x3e   :  { %46 = dma.hbm_to_vmem [thread:$0]  %s35_s20, 16, %s903_s10, [#allocation3] }
  0x3f   :  { %s53_s4 = scalar_lea.hbm %s1087_s1, %s410_s21  ;;  %p412_p0 = scmp.gt.s32.totalorder %s905_s14, 0 }
  0x40   :  { %s631_s5 = scalar_lea.hbm %s53_s4, 16  ;;  %p634_p3 = scmp.lt.u32.totalorder %s53_s4, %s1087_s1 }
  0x41   :  { %p632_p2 = scmp.ne.s32.totalorder %s53_s4, %s631_s5  ;;  %p635_p4 = scmp.lt.u32.totalorder %s920_s25, %s631_s5 }
  0x42   :  { %p637_p6 = scmp.lt.u32.totalorder %s631_s5, %s53_s4 }
  0x43   :  { %p636_p5 = por %p635_p4, %p634_p3 }
  0x45   :  { %p638_p7 = por %p637_p6, %p636_p5 }
  0x47   :  { %p639_p8 = pnand %p638_p7, %p632_p2 }
  0x49   :  { %642 = shalt.err (!%p639_p8)  }
  0x4a   :  { %s643_s8 = scalar_lea.vmem %s907_s13, 16  ;;  %p648_p10 = scmp.lt.s32.totalorder %s907_s13, %s903_s10 }
  0x4b   :  { %p644_p9 = scmp.ne.s32.totalorder %s907_s13, %s643_s8  ;;  %p649_p11 = scmp.lt.s32.totalorder %s929_s29, %s643_s8 }
  0x4d   :  { %p650_p12 = por %p649_p11, %p648_p10 }
  0x4f   :  { %p651_p13 = pnand %p650_p12, %p644_p9 }
  0x51   :  { %654 = shalt.err (!%p651_p13)  }
  0x52   :  { %66 = dma.hbm_to_vmem [thread:$0]  %s53_s4, 16, %s907_s13, [#allocation3 + $0x1] }
  0x53   :  { %s69_s9 = scalar_select %p68_p1, %s905_s14, 63 }
  0x54   :  { %p88_p2 = scmp.lt.s32.totalorder %s909_s17, 63  ;;  %p419_p3 = scmp.gt.s32.totalorder %s909_s17, 0 }
  0x55   :  { %s1101_s9 = smov (!%p412_p0, %s69_s9), 0  ;;  %s850_s15 = smov [#allocation2 + $0x3]  }
  0x56   :  { %s89_s11 = scalar_select %p88_p2, %s909_s17, 63 }
  0x57   :  { %s417_s12 = sshll.u32 %s1101_s9, 4  ;;  %s103_s2 = sshll.u32 %s850_s15, 4  ;;  %s960_s2 = int_to_ptr.vmem [resolvable:$true] %s103_s2 }
  0x58   :  { %s73_s20 = scalar_lea.hbm %s1087_s1, %s417_s12 }
  0x59   :  { %s655_s21 = scalar_lea.hbm %s73_s20, 16  ;;  %p658_p1 = scmp.lt.u32.totalorder %s73_s20, %s1087_s1 }
  0x5a   :  { %p656_p4 = scmp.ne.s32.totalorder %s73_s20, %s655_s21  ;;  %p659_p5 = scmp.lt.u32.totalorder %s920_s25, %s655_s21 }
  0x5b   :  { %p661_p7 = scmp.lt.u32.totalorder %s655_s21, %s73_s20 }
  0x5c   :  { %p660_p6 = por %p659_p5, %p658_p1 }
  0x5e   :  { %p662_p0 = por %p661_p7, %p660_p6 }
  0x60   :  { %p663_p8 = pnand %p662_p0, %p656_p4 }
  0x62   :  { %666 = shalt.err (!%p663_p8)  }
  0x63   :  { %s667_s14 = scalar_lea.vmem %s911_s16, 16  ;;  %p672_p10 = scmp.lt.s32.totalorder %s911_s16, %s903_s10 }
  0x64   :  { %p668_p9 = scmp.ne.s32.totalorder %s911_s16, %s667_s14  ;;  %p673_p11 = scmp.lt.s32.totalorder %s929_s29, %s667_s14 }
  0x66   :  { %p674_p12 = por %p673_p11, %p672_p10 }
  0x68   :  { %p675_p13 = pnand %p674_p12, %p668_p9 }
  0x6a   :  { %678 = shalt.err (!%p675_p13)  }
  0x6b   :  { %86 = dma.hbm_to_vmem [thread:$0]  %s73_s20, 16, %s911_s16, [#allocation3 + $0x2] }
  0x6c   :  { %s1103_s11 = smov (!%p419_p3, %s89_s11), 0  ;;  %s974_s23 = sld [smem:[#allocation5 + $0x4]] }
  0x6d   :  { %s424_s24 = sshll.u32 %s1103_s11, 4  ;;  %s851_s26 = smov [#allocation2 + $0x4]  }
  0x6e   :  { %s123_s27 = sshll.u32 %s851_s26, 4  ;;  %s93_s0 = scalar_lea.hbm %s1087_s1, %s424_s24  ;;  %s979_s27 = int_to_ptr.vmem [resolvable:$true] %s123_s27 }
  0x6f   :  { %s679_s4 = scalar_lea.hbm %s93_s0, 16  ;;  %p682_p4 = scmp.lt.u32.totalorder %s93_s0, %s1087_s1 }
  0x70   :  { %p680_p2 = scmp.ne.s32.totalorder %s93_s0, %s679_s4  ;;  %p683_p1 = scmp.lt.u32.totalorder %s920_s25, %s679_s4 }
  0x71   :  { %p685_p3 = scmp.lt.u32.totalorder %s679_s4, %s93_s0 }
  0x72   :  { %p684_p5 = por %p683_p1, %p682_p4 }
  0x74   :  { %p686_p6 = por %p685_p3, %p684_p5 }
  0x76   :  { %p687_p7 = pnand %p686_p6, %p680_p2 }
  0x78   :  { %690 = shalt.err (!%p687_p7)  }
  0x79   :  { %s691_s16 = scalar_lea.vmem %s960_s2, 16  ;;  %p696_p8 = scmp.lt.s32.totalorder %s960_s2, %s903_s10 }
  0x7a   :  { %p692_p0 = scmp.ne.s32.totalorder %s960_s2, %s691_s16  ;;  %p697_p9 = scmp.lt.s32.totalorder %s929_s29, %s691_s16 }
  0x7c   :  { %p698_p10 = por %p697_p9, %p696_p8 }
  0x7e   :  { %p699_p11 = pnand %p698_p10, %p692_p0 }
  0x80   :  { %702 = shalt.err (!%p699_p11)  }
  0x81   :  { %106 = dma.hbm_to_vmem [thread:$0]  %s93_s0, 16, %s960_s2, [#allocation3 + $0x3] }
  0x82   :  { %s991_s17 = sld [smem:[#allocation5 + $0x5]]  ;;  %s852_s7 = smov [#allocation2 + $0x5]  }
  0x83   :  { %s143_s8 = sshll.u32 %s852_s7, 4  ;;  %s993_s9 = sld [smem:[#allocation5 + $0x6]]  ;;  %s997_s8 = int_to_ptr.vmem [resolvable:$true] %s143_s8 }
  0x84   :  { %p108_p12 = scmp.lt.s32.totalorder %s974_s23, 63  ;;  %p426_p13 = scmp.gt.s32.totalorder %s974_s23, 0 }
  0x85   :  { %s853_s11 = smov [#allocation2 + $0x6]   ;;  %s1002_s15 = sld [smem:[#allocation5 + $0x7]] }
  0x86   :  { %s1105_s23 = smov (!%p108_p12, %s974_s23), 63  ;;  %s1000_s12 = sshll.u32 %s853_s11, 4  ;;  %s1032_s12 = int_to_ptr.vmem [resolvable:$true] %s1000_s12 }
  0x87   :  { %s1107_s23 = smov (!%p426_p13, %s1105_s23), 0 }
  0x88   :  { %p128_p2 = scmp.lt.s32.totalorder %s991_s17, 63  ;;  %s431_s2 = sshll.u32 %s1107_s23, 4 }
  0x89   :  { %p148_p1 = scmp.lt.s32.totalorder %s993_s9, 63  ;;  %s113_s20 = scalar_lea.hbm %s1087_s1, %s431_s2 }
  0x8a   :  { %s703_s21 = scalar_lea.hbm %s113_s20, 16  ;;  %p706_p6 = scmp.lt.u32.totalorder %s113_s20, %s1087_s1 }
  0x8b   :  { %p704_p3 = scmp.ne.s32.totalorder %s113_s20, %s703_s21  ;;  %p707_p7 = scmp.lt.u32.totalorder %s920_s25, %s703_s21 }
  0x8c   :  { %p709_p8 = scmp.lt.u32.totalorder %s703_s21, %s113_s20 }
  0x8d   :  { %p708_p0 = por %p707_p7, %p706_p6 }
  0x8f   :  { %p710_p9 = por %p709_p8, %p708_p0 }
  0x91   :  { %p711_p10 = pnand %p710_p9, %p704_p3 }
  0x93   :  { %714 = shalt.err (!%p711_p10)  }
  0x94   :  { %s715_s14 = scalar_lea.vmem %s979_s27, 16  ;;  %p720_p12 = scmp.lt.s32.totalorder %s979_s27, %s903_s10 }
  0x95   :  { %p716_p11 = scmp.ne.s32.totalorder %s979_s27, %s715_s14  ;;  %p721_p13 = scmp.lt.s32.totalorder %s929_s29, %s715_s14 }
  0x97   :  { %p722_p5 = por %p721_p13, %p720_p12 }
  0x99   :  { %p723_p4 = pnand %p722_p5, %p716_p11 }
  0x9b   :  { %726 = shalt.err (!%p723_p4)  }
  0x9c   :  { %126 = dma.hbm_to_vmem [thread:$0]  %s113_s20, 16, %s979_s27, [#allocation3 + $0x4] }
  0x9d   :  { %s129_s23 = scalar_select %p128_p2, %s991_s17, 63 }
  0x9e   :  { %s149_s24 = scalar_select %p148_p1, %s993_s9, 63 }
  0x9f   :  { %p1090_p3 = scmp.gt.s32.totalorder %s991_s17, 0  ;;  %p1091_p6 = scmp.gt.s32.totalorder %s993_s9, 0 }
  0xa1   :  { %s1109_s23 = smov (!%p1090_p3, %s129_s23), 0  ;;  %s1111_s24 = smov (!%p1091_p6, %s149_s24), 0 }
  0xa2   :  { %s438_s26 = sshll.u32 %s1109_s23, 4  ;;  %s445_s4 = sshll.u32 %s1111_s24, 4 }
  0xa3   :  { %s133_s0 = scalar_lea.hbm %s1087_s1, %s438_s26 }
  0xa4   :  { %s727_s5 = scalar_lea.hbm %s133_s0, 16  ;;  %p730_p2 = scmp.lt.u32.totalorder %s133_s0, %s1087_s1 }
  0xa5   :  { %p728_p4 = scmp.ne.s32.totalorder %s133_s0, %s727_s5  ;;  %p731_p5 = scmp.lt.u32.totalorder %s920_s25, %s727_s5 }
  0xa6   :  { %p733_p7 = scmp.lt.u32.totalorder %s727_s5, %s133_s0 }
  0xa7   :  { %p732_p1 = por %p731_p5, %p730_p2 }
  0xa9   :  { %p734_p0 = por %p733_p7, %p732_p1 }
  0xab   :  { %p735_p8 = pnand %p734_p0, %p728_p4 }
  0xad   :  { %738 = shalt.err (!%p735_p8)  }
  0xae   :  { %s739_s16 = scalar_lea.vmem %s997_s8, 16  ;;  %p744_p10 = scmp.lt.s32.totalorder %s997_s8, %s903_s10 }
  0xaf   :  { %p740_p9 = scmp.ne.s32.totalorder %s997_s8, %s739_s16  ;;  %p745_p11 = scmp.lt.s32.totalorder %s929_s29, %s739_s16 }
  0xb1   :  { %p746_p12 = por %p745_p11, %p744_p10 }
  0xb3   :  { %p747_p13 = pnand %p746_p12, %p740_p9 }
  0xb5   :  { %750 = shalt.err (!%p747_p13)  }
  0xb6   :  { %146 = dma.hbm_to_vmem [thread:$0]  %s133_s0, 16, %s997_s8, [#allocation3 + $0x5] }
  0xb7   :  { %s153_s9 = scalar_lea.hbm %s1087_s1, %s445_s4  ;;  %p168_p3 = scmp.lt.s32.totalorder %s1002_s15, 63 }
  0xb8   :  { %s751_s11 = scalar_lea.hbm %s153_s9, 16  ;;  %p754_p4 = scmp.lt.u32.totalorder %s153_s9, %s1087_s1 }
  0xb9   :  { %p752_p6 = scmp.ne.s32.totalorder %s153_s9, %s751_s11  ;;  %p755_p2 = scmp.lt.u32.totalorder %s920_s25, %s751_s11 }
  0xba   :  { %p757_p1 = scmp.lt.u32.totalorder %s751_s11, %s153_s9 }
  0xbb   :  { %p756_p5 = por %p755_p2, %p754_p4 }
  0xbd   :  { %p758_p7 = por %p757_p1, %p756_p5 }
  0xbf   :  { %p759_p0 = pnand %p758_p7, %p752_p6 }
  0xc1   :  { %762 = shalt.err (!%p759_p0)  }
  0xc2   :  { %s763_s8 = scalar_lea.vmem %s1032_s12, 16  ;;  %p768_p9 = scmp.lt.s32.totalorder %s1032_s12, %s903_s10 }
  0xc3   :  { %p764_p8 = scmp.ne.s32.totalorder %s1032_s12, %s763_s8  ;;  %p769_p10 = scmp.lt.s32.totalorder %s929_s29, %s763_s8 }
  0xc5   :  { %p770_p11 = por %p769_p10, %p768_p9 }
  0xc7   :  { %p771_p12 = pnand %p770_p11, %p764_p8 }
  0xc9   :  { %774 = shalt.err (!%p771_p12)  }
  0xca   :  { %166 = dma.hbm_to_vmem [thread:$0]  %s153_s9, 16, %s1032_s12, [#allocation3 + $0x6] }
  0xcb   :  { %s169_s19 = scalar_select %p168_p3, %s1002_s15, 63 }
  0xcc   :  { %p447_p13 = scmp.gt.s32.totalorder %s1002_s15, 0  ;;  %s854_s20 = smov [#allocation2 + $0x7]  }
  0xcd   :  { %s183_s21 = sshll.u32 %s854_s20, 4  ;;  %s184_s21 = int_to_ptr.vmem [resolvable:$true] %s183_s21 }
  0xce   :  { %s1113_s19 = smov (!%p447_p13, %s169_s19), 0 }
  0xcf   :  { %s452_s22 = sshll.u32 %s1113_s19, 4 }
  0xd0   :  { %s173_s23 = scalar_lea.hbm %s1087_s1, %s452_s22 }
  0xd1   :  { %s775_s24 = scalar_lea.hbm %s173_s23, 16  ;;  %p778_p4 = scmp.lt.u32.totalorder %s173_s23, %s1087_s1 }
  0xd2   :  { %p776_p6 = scmp.ne.s32.totalorder %s173_s23, %s775_s24  ;;  %p779_p2 = scmp.lt.u32.totalorder %s920_s25, %s775_s24 }
  0xd3   :  { %p781_p1 = scmp.lt.u32.totalorder %s775_s24, %s173_s23 }
  0xd4   :  { %p780_p5 = por %p779_p2, %p778_p4 }
  0xd6   :  { %p782_p3 = por %p781_p1, %p780_p5 }
  0xd8   :  { %p783_p7 = pnand %p782_p3, %p776_p6 }
  0xda   :  { %786 = shalt.err (!%p783_p7)  }
  0xdb   :  { %s787_s12 = scalar_lea.vmem %s184_s21, 16  ;;  %p792_p8 = scmp.lt.s32.totalorder %s184_s21, %s903_s10 }
  0xdc   :  { %p788_p0 = scmp.ne.s32.totalorder %s184_s21, %s787_s12  ;;  %p793_p9 = scmp.lt.s32.totalorder %s929_s29, %s787_s12 }
  0xde   :  { %p794_p10 = por %p793_p9, %p792_p8 }
  0xe0   :  { %p795_p11 = pnand %p794_p10, %p788_p0 }
  0xe2   :  { %798 = shalt.err (!%p795_p11)  }
  0xe3   :  { %186 = dma.hbm_to_vmem [thread:$0]  %s173_s23, 16, %s184_s21, [#allocation3 + $0x7] }
  0xe4   :  { %825 = dma.done.wait [#allocation3], 16 }
  0xe5   :  { %826 = vsyncadd [#allocation3], 4294967280 }
  0xe6   :  { %827 = dma.done.wait [#allocation3 + $0x1], 16 }
  0xe7   :  { %828 = vsyncadd [#allocation3 + $0x1], 4294967280 }
  0xe8   :  { %829 = dma.done.wait [#allocation3 + $0x2], 16 }
  0xe9   :  { %830 = vsyncadd [#allocation3 + $0x2], 4294967280 }
  0xea   :  { %831 = dma.done.wait [#allocation3 + $0x3], 16 }
  0xeb   :  { %832 = vsyncadd [#allocation3 + $0x3], 4294967280 }
  0xec   :  { %833 = dma.done.wait [#allocation3 + $0x4], 16 }
  0xed   :  { %834 = vsyncadd [#allocation3 + $0x4], 4294967280 }
  0xee   :  { %835 = dma.done.wait [#allocation3 + $0x5], 16 }
  0xef   :  { %836 = vsyncadd [#allocation3 + $0x5], 4294967280 }
  0xf0   :  { %837 = dma.done.wait [#allocation3 + $0x6], 16 }
  0xf1   :  { %838 = vsyncadd [#allocation3 + $0x6], 4294967280 }
  0xf2   :  { %839 = dma.done.wait [#allocation3 + $0x7], 16 }
  0xf3   :  { %840 = vsyncadd [#allocation3 + $0x7], 4294967280  ;;  %v855_v0 = vmov 0.0|0.0   ;;  %vm856_vm0 = vmmov 0   ;;  %v857_v1 = vmov 0.0   ;;  %v220_v2 = vld [vmem:[#allocation6] sm:$0xff] }
  0xf4   :  { %531 = vmatprep.subr.bf16.mxu0 %v855_v0  ;;  %528 = vmatprep.mubr.msk.f32.mxu0 %vm856_vm0, %v857_v1  ;;  %v221_v3 = vld [vmem:[#allocation6 + $0x8] sm:$0xff]  ;;  %v222_v4 = vld [vmem:[#allocation6 + $0x10] sm:$0xff]  ;;  %v223_v6 = vld [vmem:[#allocation6 + $0x18] sm:$0xff]  ;;  %s858_s1 = smov [#allocation9]  }
  0xf5   :  { %v532_v5 = vpack.c.bf16 %v221_v3, %v220_v2  ;;  %v535_v7 = vpack.c.bf16 %v223_v6, %v222_v4  ;;  %v224_v8 = vld [vmem:[#allocation6 + $0x20] sm:$0xff]  ;;  %v225_v9 = vld [vmem:[#allocation6 + $0x28] sm:$0xff]  ;;  %v212_v10 = vld [vmem:[#allocation2] sm:$0xff]  ;;  %s318_s10 = sshll.u32 %s858_s1, 4  ;;  %s319_s10 = int_to_ptr.vmem [resolvable:$true] %s318_s10 }
  0xf6   :  { %v453_v11 = vmul.f32 -1.442695, %v212_v10  ;;  %v538_v12 = vpack.c.bf16 %v225_v9, %v224_v8  ;;  %v226_v13 = vld [vmem:[#allocation6 + $0x30] sm:$0xff]  ;;  %v227_v14 = vld [vmem:[#allocation6 + $0x38] sm:$0xff]  ;;  %v228_v16 = vld [vmem:[#allocation6 + $0x40] sm:$0xff]  ;;  %s799_s25 = scalar_lea.vmem %s319_s10, 128  ;;  %p804_p13 = scmp.lt.s32.totalorder %s319_s10, %s319_s10 }
  0xf7   :  { %533 = vmatpush3.bf16.msra.mxu0 %v532_v5  ;;  %v541_v15 = vpack.c.bf16 %v227_v14, %v226_v13  ;;  %v229_v17 = vld [vmem:[#allocation6 + $0x48] sm:$0xff]  ;;  %v230_v19 = vld [vmem:[#allocation6 + $0x50] sm:$0xff]  ;;  %v231_v20 = vld [vmem:[#allocation6 + $0x58] sm:$0xff]  ;;  %p800_p12 = scmp.ne.s32.totalorder %s319_s10, %s799_s25  ;;  %p805_p6 = scmp.lt.s32.totalorder %s799_s25, %s799_s25 }
  0xf8   :  { %534 = vmatprep.subr.bf16.mxu0 %v855_v0  ;;  %571 = vpow2.f32 %v453_v11  ;;  %v544_v18 = vpack.c.bf16 %v229_v17, %v228_v16  ;;  %v547_v22 = vpack.c.bf16 %v231_v20, %v230_v19  ;;  %v232_v24 = vld [vmem:[#allocation6 + $0x60] sm:$0xff]  ;;  %v233_v25 = vld [vmem:[#allocation6 + $0x68] sm:$0xff]  ;;  %v234_v27 = vld [vmem:[#allocation6 + $0x70] sm:$0xff] }
  0xf9   :  { %v550_v26 = vpack.c.bf16 %v233_v25, %v232_v24  ;;  %v235_v28 = vld [vmem:[#allocation6 + $0x78] sm:$0xff]  ;;  %v454_v32 = vld [vmem:[#allocation6 + $0x80] ss:$0 sm:$0xff]  ;;  %p806_p4 = por %p805_p6, %p804_p13 }
  0xfa   :  { %v553_v29 = vpack.c.bf16 %v235_v28, %v234_v27 }
  0xfb   :  { %536 = vmatpush3.bf16.msra.mxu0 %v535_v7  ;;  %p807_p2 = pnand %p806_p4, %p800_p12 }
  0xfc   :  { %537 = vmatprep.subr.bf16.mxu0 %v855_v0 }
  0xff   :  { %539 = vmatpush3.bf16.msra.mxu0 %v538_v12 }
 0x100   :  { %540 = vmatprep.subr.bf16.mxu0 %v855_v0 }
 0x102   :  { %v572_v21 = vpop.eup %571 }
 0x103   :  { %542 = vmatpush3.bf16.msra.mxu0 %v541_v15  ;;  %v216_v23 = vadd.f32 1.0, %v572_v21 }
 0x104   :  { %543 = vmatprep.subr.bf16.mxu0 %v855_v0 }
 0x105   :  { %573 = vrcp.f32 %v216_v23 }
 0x107   :  { %545 = vmatpush3.bf16.msra.mxu0 %v544_v18 }
 0x108   :  { %546 = vmatprep.subr.bf16.mxu0 %v855_v0 }
 0x10b   :  { %548 = vmatpush3.bf16.msra.mxu0 %v547_v22 }
 0x10c   :  { %549 = vmatprep.subr.bf16.mxu0 %v855_v0 }
 0x10f   :  { %551 = vmatpush3.bf16.msra.mxu0 %v550_v26  ;;  %v574_v30 = vpop.eup %573 }
 0x110   :  { %552 = vmatprep.subr.bf16.mxu0 %v855_v0  ;;  %v219_v31 = vmul.f32 %v574_v30, %v212_v10 }
 0x113   :  { %554 = vmatpush3.bf16.msra.mxu0 %v553_v29 }
 0x116   :  { %529 = vmatmul.mubr.f32.vlgmr.msra.gmra.mrb[0].mxu0 %v219_v31 }
 0x1e9   :  { %v307_v33 = vpop.f32.mrb[0].mxu0 }
 0x1ea   :  { %v308_v34 = vadd.f32 %v454_v32, %v307_v33  ;;  %v530_v35 = vpop.f32.mrb[1].mxu0 }
 0x1ec   :  { %311 = vst [vmem:[#allocation9] sm:$0xff] %v308_v34 }
 0x1ed   :  { %810 = shalt.err (!%p807_p2)
}
 0x1ee   :  { %s811_s30 = scalar_lea.hbm %s1089_s3, 128 }
 0x1ef   :  { %p812_p5 = scmp.ne.s32.totalorder %s1089_s3, %s811_s30  ;;  %p815_p1 = scmp.lt.u32.totalorder %s811_s30, %s1089_s3 }
 0x1f1   :  { %p817_p3 = pnand %p815_p1, %p812_p5 }
 0x1f3   :  { %820 = shalt.err (!%p817_p3)
}
 0x1f4   :  { %321 = dma.vmem_to_hbm [thread:$0]  %s319_s10, 128, %s1089_s3, [#allocation8]  }
 0x1f5   :  { %841 = dma.done.wait [#allocation8], 128  }
 0x1f6   :  { %842 = vsyncadd [#allocation8], 4294967168 }
 0x1f7   :  { %325 = vsyncpa [#allocation7], 1 }
 0x1f8   :  { %326 = vsyncpa [#allocation8], 1 }
 0x1f9   :  { %327 = vsyncmov [#allocation3] }
 0x1fc   :  { %s328_s17 = vpop.sfrf %327 }
 0x1fd   :  { %p455_p7 = scmp.ne.s32.totalorder %s328_s17, 0 }
 0x1ff   :  { %332 = shalt.err (%p455_p7)  }
 0x200   :  { %334 = vsyncmov [#allocation3 + $0x1] }
 0x203   :  { %s335_s7 = vpop.sfrf %334 }
 0x204   :  { %p456_p0 = scmp.ne.s32.totalorder %s335_s7, 0 }
 0x206   :  { %339 = shalt.err (%p456_p0)  }
 0x207   :  { %341 = vsyncmov [#allocation3 + $0x2] }
 0x20a   :  { %s342_s9 = vpop.sfrf %341 }
 0x20b   :  { %p457_p8 = scmp.ne.s32.totalorder %s342_s9, 0 }
 0x20d   :  { %346 = shalt.err (%p457_p8)  }
 0x20e   :  { %348 = vsyncmov [#allocation3 + $0x3] }
 0x211   :  { %s349_s11 = vpop.sfrf %348 }
 0x212   :  { %p458_p9 = scmp.ne.s32.totalorder %s349_s11, 0 }
 0x214   :  { %353 = shalt.err (%p458_p9)  }
 0x215   :  { %355 = vsyncmov [#allocation3 + $0x4] }
 0x218   :  { %s356_s3 = vpop.sfrf %355 }
 0x219   :  { %p459_p10 = scmp.ne.s32.totalorder %s356_s3, 0 }
 0x21b   :  { %360 = shalt.err (%p459_p10)  }
 0x21c   :  { %362 = vsyncmov [#allocation3 + $0x5] }
 0x21f   :  { %s363_s2 = vpop.sfrf %362 }
 0x220   :  { %p460_p11 = scmp.ne.s32.totalorder %s363_s2, 0 }
 0x222   :  { %367 = shalt.err (%p460_p11)  }
 0x223   :  { %369 = vsyncmov [#allocation3 + $0x6] }
 0x226   :  { %s370_s18 = vpop.sfrf %369 }
 0x227   :  { %p461_p12 = scmp.ne.s32.totalorder %s370_s18, 0 }
 0x229   :  { %374 = shalt.err (%p461_p12)  }
 0x22a   :  { %376 = vsyncmov [#allocation3 + $0x7] }
 0x22d   :  { %s377_s8 = vpop.sfrf %376 }
 0x22e   :  { %p462_p13 = scmp.ne.s32.totalorder %s377_s8, 0 }
 0x230   :  { %381 = shalt.err (%p462_p13)  }

</bundles_post_ra>
